<compile_context>
chip_gen: v5e
topology: v5e:2x2
jax: 0.10.0
libtpu: 0.0.40
codegen_flags: <defaults>
</compile_context>

<pallas_src>
import functools

import numpy as np
import jax
import jax.numpy as jnp
from jax.experimental import pallas as pl
from jax.experimental.pallas import tpu as pltpu

# ---- small, TPU-friendly model sizes (structure matches the torch module) ----
EMB_DIM = 32           # embedding_dim
H_DIM = 32             # h_dim
MID_DIM = 128          # first MLP hidden (512 in the paper)
BOT_DIM = 128          # bottleneck_dim (1024 in the paper)
MAX_PED = 8            # max pedestrians per sequence
MAX_S_PER_STEP = 32    # cap on sequences packed per grid step
BN_EPS = 1e-5
X_COLS = 2 + H_DIM + 1  # [P_x, P_y | H | 1]


def _pool_kernel(x_ref, w1_ref, w2_ref, b2_ref, out_ref, *, S):
    M = MAX_PED
    X = x_ref[...]                                       # (S*M, 35)  [P | H | 1]
    W1 = w1_ref[...]                                     # (35, MID)  [wf_s; w1h_s; c1_s]

    # U'[s, j] = P_j @ wf_s + H_j @ w1h_s + c1_s  (bias folded via the ones column)
    U = jnp.dot(X, W1, preferred_element_type=jnp.float32)          # (S*M, MID)
    # EW[s, i] = P_i @ wf_s  (K=2 -> two lane-broadcast FMAs, no MXU needed)
    EW = X[:, 0:1] * W1[0:1, :] + X[:, 1:2] * W1[1:2, :]            # (S*M, MID)

    # pairwise rows within each sequence (BN1 already folded into W1):
    #   z1[s, i, j] = emb(P_j - P_i) @ W1e + H_j @ W1h + b1 = U'[s, j] - EW[s, i]
    U4 = U.reshape(S, 1, M, MID_DIM)
    E4 = EW.reshape(S, M, 1, MID_DIM)
    a1 = jnp.maximum((U4 - E4).reshape(S * M * M, MID_DIM), 0.0)

    z2 = jnp.dot(a1, w2_ref[...], preferred_element_type=jnp.float32) + b2_ref[...]
    a2 = jnp.maximum(z2, 0.0)                                        # (S*M*M, BOT)

    # padded j-columns were packed as duplicates of pedestrian 0 of the same
    # sequence, so max over all M columns == max over the n real columns (exact).
    out_ref[...] = jnp.max(a2.reshape(S * M, M, BOT_DIM), axis=1)    # (S*M, BOT)


def pool_hidden_net_forward(h_states, seq_start_end, end_pos, params):
    """seq_start_end: static python tuple of (start, end) tuples."""
    (wse, bse, w1, b1, g1, be1, rm1, rv1,
     w2, b2, g2, be2, rm2, rv2) = params

    # ---------------- static packing plan (python/numpy, compile-time) ----------------
    num_seq = len(seq_start_end)
    batch = end_pos.shape[0]
    M = MAX_PED

    # pick S so there are >= 2 grid steps whenever num_seq >= 2 (v7x megacore),
    # capped at MAX_S_PER_STEP for VMEM friendliness.
    S = max(1, min(MAX_S_PER_STEP, -(-num_seq // 2)))
    num_steps = -(-num_seq // S)
    nsp = num_steps * S

    src = np.zeros((nsp, M), dtype=np.int32)
    gather = []
    for k, (s, e) in enumerate(seq_start_end):
        n = e - s
        assert 1 <= n <= M  # TODO(synk): tile sequences with > MAX_PED pedestrians
        src[k, :n] = np.arange(s, e, dtype=np.int32)
        src[k, n:] = s          # duplicate first pedestrian -> exact under max, no mask
        gather.extend(k * M + p for p in range(n))
    src = jnp.asarray(src.reshape(-1))
    gather = jnp.asarray(np.asarray(gather, dtype=np.int32))

    # ------- fold BN(eval), spatial embedding and linear-1 bias into the weights -------
    s1 = g1 / jnp.sqrt(rv1 + BN_EPS)
    sh1 = be1 - rm1 * s1
    s2 = g2 / jnp.sqrt(rv2 + BN_EPS)
    sh2 = be2 - rm2 * s2
    w1e = w1[:EMB_DIM]                      # (EMB, MID)
    w1h = w1[EMB_DIM:]                      # (H,   MID)
    wf_s = (wse @ w1e) * s1                 # (2, MID)    spatial emb folded + BN1 scale
    w1h_s = w1h * s1                        # (H, MID)
    c1_s = (bse @ w1e + b1) * s1 + sh1      # (MID,)      all linear-1 constants + BN1
    W1 = jnp.concatenate([wf_s, w1h_s, c1_s.reshape(1, -1)], axis=0)   # (35, MID)
    W2 = w2 * s2                                                       # (MID, BOT)
    B2 = (b2 * s2 + sh2).reshape(1, -1)                                # (1, BOT)

    # ------------- pre-pack the per-step input tile X = [P | H | 1] -------------
    h = h_states.reshape(-1, H_DIM)
    hp = jnp.take(h, src, axis=0)                        # (nsp*M, H_DIM)
    pp = jnp.take(end_pos, src, axis=0)                  # (nsp*M, 2)
    ones = jnp.ones((nsp * M, 1), dtype=h.dtype)
    X = jnp.concatenate([pp, hp, ones], axis=1)          # (nsp*M, 35)

    kern = functools.partial(_pool_kernel, S=S)
    out_flat = pl.pallas_call(
        kern,
        out_shape=jax.ShapeDtypeStruct((nsp * M, BOT_DIM), jnp.float32),
        grid_spec=pltpu.PrefetchScalarGridSpec(
            num_scalar_prefetch=0,
            grid=(num_steps,),
            in_specs=[
                pl.BlockSpec((S * M, X_COLS), lambda t: (t, 0)),
                pl.BlockSpec((X_COLS, MID_DIM), lambda t: (0, 0)),
                pl.BlockSpec((MID_DIM, BOT_DIM), lambda t: (0, 0)),
                pl.BlockSpec((1, BOT_DIM), lambda t: (0, 0)),
            ],
            out_specs=pl.BlockSpec((S * M, BOT_DIM), lambda t: (t, 0)),
        ),
        compiler_params=pltpu.CompilerParams(
            dimension_semantics=("parallel",)),
    )(X, W1, W2, B2)

    # compact padded slab -> (batch, BOT) in torch concat order with a single gather
    return jnp.take(out_flat, gather, axis=0)


# ---------------- pure-JAX reference (mirrors the torch forward) ----------------
def ref_forward(h_states, seq_start_end, end_pos, params):
    (wse, bse, w1, b1, g1, be1, rm1, rv1,
     w2, b2, g2, be2, rm2, rv2) = params
    s1 = g1 / jnp.sqrt(rv1 + BN_EPS)
    sh1 = be1 - rm1 * s1
    s2 = g2 / jnp.sqrt(rv2 + BN_EPS)
    sh2 = be2 - rm2 * s2
    h = h_states.reshape(-1, H_DIM)
    outs = []
    for (s, e) in seq_start_end:
        n = e - s
        ch = h[s:e]
        cp = end_pos[s:e]
        ch1 = jnp.tile(ch, (n, 1))                 # curr_hidden.repeat(n, 1)
        cp1 = jnp.tile(cp, (n, 1))                 # curr_end_pos.repeat(n, 1)
        cp2 = jnp.repeat(cp, n, axis=0)            # self.repeat(curr_end_pos, n)
        rel = cp1 - cp2
        emb = rel @ wse + bse
        x = jnp.concatenate([emb, ch1], axis=1)
        a1 = jnp.maximum((x @ w1 + b1) * s1 + sh1, 0.0)
        a2 = jnp.maximum((a1 @ w2 + b2) * s2 + sh2, 0.0)
        outs.append(a2.reshape(n, n, -1).max(axis=1))
    return jnp.concatenate(outs, axis=0)


def make_params(key):
    ks = jax.random.split(key, 10)
    wse = 0.1 * jax.random.normal(ks[0], (2, EMB_DIM), jnp.float32)
    bse = 0.1 * jax.random.normal(ks[1], (EMB_DIM,), jnp.float32)
    w1 = 0.1 * jax.random.normal(ks[2], (EMB_DIM + H_DIM, MID_DIM), jnp.float32)
    b1 = 0.1 * jax.random.normal(ks[3], (MID_DIM,), jnp.float32)
    g1 = 1.0 + 0.1 * jax.random.normal(ks[4], (MID_DIM,), jnp.float32)
    be1 = 0.1 * jax.random.normal(ks[5], (MID_DIM,), jnp.float32)
    rm1 = 0.05 * jax.random.normal(ks[6], (MID_DIM,), jnp.float32)
    rv1 = 1.0 + 0.1 * jax.random.uniform(ks[7], (MID_DIM,), jnp.float32)
    w2 = 0.1 * jax.random.normal(ks[8], (MID_DIM, BOT_DIM), jnp.float32)
    b2 = 0.1 * jax.random.normal(ks[9], (BOT_DIM,), jnp.float32)
    ks2 = jax.random.split(ks[9], 4)
    g2 = 1.0 + 0.1 * jax.random.normal(ks2[0], (BOT_DIM,), jnp.float32)
    be2 = 0.1 * jax.random.normal(ks2[1], (BOT_DIM,), jnp.float32)
    rm2 = 0.05 * jax.random.normal(ks2[2], (BOT_DIM,), jnp.float32)
    rv2 = 1.0 + 0.1 * jax.random.uniform(ks2[3], (BOT_DIM,), jnp.float32)
    return (wse, bse, w1, b1, g1, be1, rm1, rv1, w2, b2, g2, be2, rm2, rv2)


if __name__ == "__main__":
    key = jax.random.PRNGKey(0)
    kp, kh, ke = jax.random.split(key, 3)

    params = make_params(kp)

    # ten sequences (sizes 8,5,3,6,2,7,4,1,8,3) -> batch = 47; S = 5 -> 2 grid steps
    sizes = (8, 5, 3, 6, 2, 7, 4, 1, 8, 3)
    starts = np.concatenate([[0], np.cumsum(sizes)])
    seq_start_end = tuple((int(starts[i]), int(starts[i + 1])) for i in range(len(sizes)))
    batch = seq_start_end[-1][1]

    h_states = jax.random.normal(kh, (1, batch, H_DIM), jnp.float32)   # (num_layers, batch, h_dim)
    end_pos = jax.random.normal(ke, (batch, 2), jnp.float32)           # (batch, 2)

    fwd = jax.jit(pool_hidden_net_forward, static_argnums=(1,))
    out = fwd(h_states, seq_start_end, end_pos, params)
    out = jax.block_until_ready(out)

    ref = ref_forward(h_states, seq_start_end, end_pos, params)
    assert out.shape == (batch, BOT_DIM), out.shape
    assert jnp.allclose(out, ref, atol=1e-4, rtol=1e-4), (
        float(jnp.max(jnp.abs(out - ref))))

    print("KERNEL_OK")
</pallas_src>

<mosaic_0001>
module attributes {stable_mosaic.version = 11 : i64} {
  func.func @_pool_kernel(%arg0: i32, %arg1: memref<40x35xf32, #tpu.memory_space<vmem>>, %arg2: memref<35x128xf32, #tpu.memory_space<vmem>>, %arg3: memref<128x128xf32, #tpu.memory_space<vmem>>, %arg4: memref<1x128xf32, #tpu.memory_space<vmem>>, %arg5: memref<40x128xf32, #tpu.memory_space<vmem>>) attributes {dimension_semantics = [#tpu.dimension_semantics<parallel>], iteration_bounds = array<i64: 2>, scalar_prefetch = 0 : i64, scratch_operands = 0 : i64, tpu.core_type = #tpu.core_type<tc>, window_params = [{transform_indices = @transform_0, window_bounds = array<i64: 40, 35>}, {pipeline_mode = #tpu.pipeline_mode<synchronous>, transform_indices = @transform_1, window_bounds = array<i64: 35, 128>}, {pipeline_mode = #tpu.pipeline_mode<synchronous>, transform_indices = @transform_2, window_bounds = array<i64: 128, 128>}, {pipeline_mode = #tpu.pipeline_mode<synchronous>, transform_indices = @transform_3, window_bounds = array<i64: 1, 128>}, {transform_indices = @transform_4, window_bounds = array<i64: 40, 128>}]} {
    %c0 = arith.constant 0 : index
    %c0_0 = arith.constant 0 : index
    %0 = vector.load %arg1[%c0, %c0_0] : memref<40x35xf32, #tpu.memory_space<vmem>>, vector<40x35xf32>
    %c0_1 = arith.constant 0 : index
    %c0_2 = arith.constant 0 : index
    %1 = vector.load %arg2[%c0_1, %c0_2] : memref<35x128xf32, #tpu.memory_space<vmem>>, vector<35x128xf32>
    %cst = arith.constant dense<0.000000e+00> : vector<40x128xf32>
    %2 = tpu.matmul %0, %1, %cst {dimension_numbers = #tpu.dot_dimension_numbers<[1], [0], [0], [1], [0, 0, 1, 1], [], []>} : vector<40x35xf32>, vector<35x128xf32>, vector<40x128xf32> -> vector<40x128xf32>
    %3 = vector.extract_strided_slice %0 {offsets = [0, 0], sizes = [40, 1], strides = [1, 1]} : vector<40x35xf32> to vector<40x1xf32>
    %4 = vector.extract_strided_slice %1 {offsets = [0, 0], sizes = [1, 128], strides = [1, 1]} : vector<35x128xf32> to vector<1x128xf32>
    %5 = vector.broadcast %3 : vector<40x1xf32> to vector<40x128xf32>
    %6 = vector.broadcast %4 : vector<1x128xf32> to vector<40x128xf32>
    %7 = arith.mulf %5, %6 : vector<40x128xf32>
    %8 = vector.extract_strided_slice %0 {offsets = [0, 1], sizes = [40, 1], strides = [1, 1]} : vector<40x35xf32> to vector<40x1xf32>
    %9 = vector.extract_strided_slice %1 {offsets = [1, 0], sizes = [1, 128], strides = [1, 1]} : vector<35x128xf32> to vector<1x128xf32>
    %10 = vector.broadcast %8 : vector<40x1xf32> to vector<40x128xf32>
    %11 = vector.broadcast %9 : vector<1x128xf32> to vector<40x128xf32>
    %12 = arith.mulf %10, %11 : vector<40x128xf32>
    %13 = arith.addf %7, %12 : vector<40x128xf32>
    %14 = vector.shape_cast %2 : vector<40x128xf32> to vector<5x1x8x128xf32>
    %15 = vector.shape_cast %13 : vector<40x128xf32> to vector<5x8x1x128xf32>
    %16 = vector.broadcast %14 : vector<5x1x8x128xf32> to vector<5x8x8x128xf32>
    %17 = vector.broadcast %15 : vector<5x8x1x128xf32> to vector<5x8x8x128xf32>
    %18 = arith.subf %16, %17 : vector<5x8x8x128xf32>
    %19 = vector.shape_cast %18 : vector<5x8x8x128xf32> to vector<320x128xf32>
    %cst_3 = arith.constant 0.000000e+00 : f32
    %20 = vector.broadcast %cst_3 : f32 to vector<320x128xf32>
    %21 = arith.maximumf %19, %20 : vector<320x128xf32>
    %c0_4 = arith.constant 0 : index
    %c0_5 = arith.constant 0 : index
    %22 = vector.load %arg3[%c0_4, %c0_5] : memref<128x128xf32, #tpu.memory_space<vmem>>, vector<128x128xf32>
    %cst_6 = arith.constant dense<0.000000e+00> : vector<320x128xf32>
    %23 = tpu.matmul %21, %22, %cst_6 {dimension_numbers = #tpu.dot_dimension_numbers<[1], [0], [0], [1], [0, 0, 1, 1], [], []>} : vector<320x128xf32>, vector<128x128xf32>, vector<320x128xf32> -> vector<320x128xf32>
    %c0_7 = arith.constant 0 : index
    %c0_8 = arith.constant 0 : index
    %24 = vector.load %arg4[%c0_7, %c0_8] : memref<1x128xf32, #tpu.memory_space<vmem>>, vector<1x128xf32>
    %25 = vector.broadcast %24 : vector<1x128xf32> to vector<320x128xf32>
    %26 = arith.addf %23, %25 : vector<320x128xf32>
    %cst_9 = arith.constant 0.000000e+00 : f32
    %27 = vector.broadcast %cst_9 : f32 to vector<320x128xf32>
    %28 = arith.maximumf %26, %27 : vector<320x128xf32>
    %29 = vector.shape_cast %28 : vector<320x128xf32> to vector<40x8x128xf32>
    %cst_10 = arith.constant dense<0xFF800000> : vector<40x128xf32>
    %30 = vector.multi_reduction <maximumf>, %29, %cst_10 [1] : vector<40x8x128xf32> to vector<40x128xf32>
    %c0_11 = arith.constant 0 : index
    %c0_12 = arith.constant 0 : index
    %31 = vector.load %arg5[%c0_11, %c0_12] : memref<40x128xf32, #tpu.memory_space<vmem>>, vector<40x128xf32>
    tpu.vector_store %arg5[%c0_11, %c0_12], %30 {strides = array<i32>} : memref<40x128xf32, #tpu.memory_space<vmem>>, vector<40x128xf32>,
    return
  }
  func.func @transform_0(%arg0: i32) -> (i32, i32) {
    %c0_i32 = arith.constant 0 : i32
    %c0_i32_0 = arith.constant 0 : i32
    return %arg0, %c0_i32 : i32, i32
  }
  func.func @transform_1(%arg0: i32) -> (i32, i32) {
    %c0_i32 = arith.constant 0 : i32
    %c0_i32_0 = arith.constant 0 : i32
    %c0_i32_1 = arith.constant 0 : i32
    return %c0_i32, %c0_i32_0 : i32, i32
  }
  func.func @transform_2(%arg0: i32) -> (i32, i32) {
    %c0_i32 = arith.constant 0 : i32
    %c0_i32_0 = arith.constant 0 : i32
    %c0_i32_1 = arith.constant 0 : i32
    return %c0_i32, %c0_i32_0 : i32, i32
  }
  func.func @transform_3(%arg0: i32) -> (i32, i32) {
    %c0_i32 = arith.constant 0 : i32
    %c0_i32_0 = arith.constant 0 : i32
    %c0_i32_1 = arith.constant 0 : i32
    return %c0_i32, %c0_i32_0 : i32, i32
  }
  func.func @transform_4(%arg0: i32) -> (i32, i32) {
    %c0_i32 = arith.constant 0 : i32
    %c0_i32_0 = arith.constant 0 : i32
    return %arg0, %c0_i32 : i32, i32
  }
}

</mosaic_0001>

<bundles_post_ra>
// kernel: pool_hidden_net_forward.1
= control target key start
LH: loop header
LB: loop body
LE: loop exit
PB: predicated region body
PF: predicated region fallthrough
CT: control target
= control target key end

     0   :  { %s1224_s15 = smov 0   ;;  %s1610_s0 = inlined_call_operand.vmem [shape: f32[80,35], index: 0, kind: input, shape index: {}]   ;;  %s1611_s1 = inlined_call_operand.vmem [shape: f32[35,128], index: 1, kind: input, shape index: {}]   ;;  %s1612_s2 = inlined_call_operand.vmem [shape: f32[128,128], index: 2, kind: input, shape index: {}]   ;;  %s1613_s3 = inlined_call_operand.vmem [shape: f32[1,128], index: 3, kind: input, shape index: {}]   ;;  %s1614_s4 = inlined_call_operand.vmem [shape: f32[80,128], index: 4, kind: output, shape index: {}]  }
   0x1 LB: > { %s1105_s16 = sadd.s32 4294967295, %s1195_s15   ;;  %p1109_p0 = scmp.ge.s32.totalorder %s1195_s15, 1  ;;  %s1195_s15 = sphi %s1224_s15, %s14_s15  }
   0x2   : > { %p163_p1 = scmp.lt.s32.totalorder %s1195_s15, 3 }
   0x4   : > { %p164_p2 = pnand %p1109_p0, %p163_p1 }
   0x5   : > { %s189_s21 = smul.u32 (!%p164_p2), 5, %s1105_s16 }
   0x6   : > { %167 = sbr.rel (%p164_p2) target bundleno = 406 (0x196), region = 36 }
   0x7   : > { %p190_p3 = scmp.lt.s32.totalorder (!%p164_p2), %s189_s21, 9 }
   0xb   : > { %v210_v0 = vld [vmem:[%s1611_s1 + $0x20] sm:$0x7]  ;;  %vm227_vm0 = vcmask 1042432   ;;  %v209_v1 = vld [vmem:[%s1611_s1 + $0x18] sm:$0xff]  ;;  %v1197_v2 = vmov 0   ;;  %v208_v3 = vld [vmem:[%s1611_s1 + $0x10] sm:$0xff] }
   0xc   : > { %1112 = vmatpush.msk.msra.mxu0 %vm227_vm0, %v210_v0  ;;  %1180 = vset.pattern.permute.xlu1 %v1197_v2  ;;  %v207_v4 = vld [vmem:[%s1611_s1 + $0x8] sm:$0xff]  ;;  %s1616_s21 = smov (!%p190_p3, %s189_s21), 9  ;;  %v1249_v5 = vld [vmem:[%s1611_s1] sm:$0xff]  ;;  %vm211_vm1 = vcmask 285696   ;;  %v535_v10 = vld [vmem:[%s1612_s2 + $0x78] sm:$0xff]  ;;  %v1198_v13 = vmov 1  }
   0xd   : > { %1178 = vset.pattern.permute.xlu0 %v1197_v2  ;;  %1182 = vset.pattern.permute.xlu2 %v1197_v2  ;;  %s1110_s28 = sshll.u32 %s1616_s21, 3  ;;  %v534_v11 = vld [vmem:[%s1612_s2 + $0x70] sm:$0xff]  ;;  %v533_v12 = vld [vmem:[%s1612_s2 + $0x68] sm:$0xff]  ;;  %v532_v14 = vld [vmem:[%s1612_s2 + $0x60] sm:$0xff]  ;;  %v1319_v31 = vperm.slane %v1249_v5, 0  ;;  %v1322_v32 = vperm.slane %v1249_v5, 1 }
   0xe   : > { %243 = vmatpush.msra.mxu0 %v209_v1  ;;  %s1257_s5 = scalar_lea.vmem %s1610_s0, %s1110_s28  ;;  %1120 = vmatpush.msra.mxu1 %v535_v10  ;;  %v531_v15 = vld [vmem:[%s1612_s2 + $0x58] sm:$0xff]  ;;  %v530_v17 = vld [vmem:[%s1612_s2 + $0x50] sm:$0xff]  ;;  %v529_v18 = vld [vmem:[%s1612_s2 + $0x48] sm:$0xff]  ;;  %vm997_vm2 = vcmask 1041409   ;;  %vm999_vm3 = vcmask 1042434   ;;  %vm1001_vm4 = vcmask 1043459   ;;  %s1536_s20 = scalar_lea.vmem %s1614_s4, %s1110_s28 }
   0xf   : > { %v204_v6 = vld [vmem:[%s1257_s5 + $0x18] sm:$0xff]  ;;  %v201_v7 = vld [vmem:[%s1257_s5] sm:$0xff]  ;;  %v203_v8 = vld [vmem:[%s1257_s5 + $0x10] sm:$0xff]  ;;  %1121 = vmatpush.msra.mxu2 %v535_v10  ;;  %1122 = vmatpush.msra.mxu3 %v535_v10  ;;  %vm1003_vm5 = vcmask 1044484   ;;  %vm1005_vm6 = vcmask 1045509   ;;  %vm1007_vm7 = vcmask 1046534  }
  0x10   : > { %244 = vmatpush.msra.mxu0 %v208_v3  ;;  %276 = vperm.xlu1 %1180, %v204_v6   ;;  %v202_v9 = vld [vmem:[%s1257_s5 + $0x8] sm:$0xff]  ;;  %v205_v16 = vld [vmem:[%s1257_s5 + $0x20] sm:$0xff]  ;;  %v527_v20 = vld [vmem:[%s1612_s2 + $0x38] sm:$0xff]  ;;  %vm1009_vm8 = vcmask 1047559  }
  0x11   : > { %272 = vperm.xlu0 %1178, %v203_v8   ;;  %268 = vperm.xlu2 %1182, %v202_v9   ;;  %v528_v19 = vld [vmem:[%s1612_s2 + $0x40] sm:$0xff]  ;;  %v526_v21 = vld [vmem:[%s1612_s2 + $0x30] sm:$0xff]  ;;  %v525_v22 = vld [vmem:[%s1612_s2 + $0x28] sm:$0xff] }
  0x12   : > { %245 = vmatpush.msra.mxu0 %v207_v4  ;;  %1123 = vmatpush.msra.mxu1 %v534_v11  ;;  %v524_v23 = vld [vmem:[%s1612_s2 + $0x20] sm:$0xff]  ;;  %v523_v24 = vld [vmem:[%s1612_s2 + $0x18] sm:$0xff]  ;;  %v522_v25 = vld [vmem:[%s1612_s2 + $0x10] sm:$0xff] }
  0x13   : > { %1124 = vmatpush.msra.mxu2 %v534_v11  ;;  %1125 = vmatpush.msra.mxu3 %v534_v11  ;;  %v521_v26 = vld [vmem:[%s1612_s2 + $0x8] sm:$0xff]  ;;  %v520_v27 = vld [vmem:[%s1612_s2] sm:$0xff] }
  0x14   : > { %246 = vmatpush.msra.mxu0 %v1249_v5  ;;  %1126 = vmatpush.msra.mxu1 %v533_v12 }
  0x15   : > { %1113 = vmatmul.msk.f32.vlgmr.msra.gmra.mxu0 %vm211_vm1, %v201_v7  ;;  %1127 = vmatpush.msra.mxu2 %v533_v12 }
  0x16   : > { %540 = vmatpush.msrb.mxu0 %v535_v10  ;;  %1128 = vmatpush.msra.mxu3 %v533_v12 }
  0x17   : > { %1129 = vmatpush.msra.mxu1 %v532_v14  ;;  %1130 = vmatpush.msra.mxu2 %v532_v14 }
  0x18   : > { %541 = vmatpush.msrb.mxu0 %v534_v11  ;;  %1181 = vset.pattern.permute.xlu1 %v1198_v13 }
  0x19   : > { %302 = vperm.xlu1 %1181, %v204_v6   ;;  %1179 = vset.pattern.permute.xlu0 %v1198_v13 }
  0x1a   : > { %542 = vmatpush.msrb.mxu0 %v533_v12  ;;  %298 = vperm.xlu0 %1179, %v203_v8  }
  0x1b   : > { %1183 = vset.pattern.permute.xlu2 %v1198_v13  ;;  %1132 = vmatpush.msra.mxu1 %v531_v15 }
  0x1c   : > { %294 = vperm.xlu2 %1183, %v202_v9   ;;  %543 = vmatpush.msrb.mxu0 %v532_v14 }
  0x1d   : > { %1114 = vmatmul.msk.f32.gmra.mxu0 %vm211_vm1, %v202_v9  ;;  %1131 = vmatpush.msra.mxu3 %v532_v14 }
  0x1e   : > { %1133 = vmatpush.msra.mxu2 %v531_v15  ;;  %544 = vmatpush.msrb.mxu0 %v531_v15 }
  0x1f   : > { %1134 = vmatpush.msra.mxu3 %v531_v15  ;;  %1135 = vmatpush.msra.mxu1 %v530_v17 }
  0x20   : > { %1136 = vmatpush.msra.mxu2 %v530_v17  ;;  %545 = vmatpush.msrb.mxu0 %v530_v17 }
  0x21   : > { %1184 = vset.pattern.permute.xlu1 %v1197_v2  ;;  %1137 = vmatpush.msra.mxu3 %v530_v17 }
  0x22   : > { %280 = vperm.xlu1 %1184, %v205_v16   ;;  %1185 = vset.pattern.permute.xlu0 %v1197_v2 }
  0x23   : > { %264 = vperm.xlu0 %1185, %v201_v7   ;;  %1138 = vmatpush.msra.mxu1 %v529_v18 }
  0x24   : > { %306 = vperm.xlu2 %1183, %v205_v16   ;;  %1139 = vmatpush.msra.mxu2 %v529_v18 }
  0x25   : > { %1115 = vmatmul.msk.f32.gmra.mxu0 %vm211_vm1, %v203_v8  ;;  %1140 = vmatpush.msra.mxu3 %v529_v18 }
  0x26   : > { %546 = vmatpush.msrb.mxu0 %v529_v18  ;;  %1141 = vmatpush.msra.mxu1 %v528_v19 }
  0x27   : > { %1142 = vmatpush.msra.mxu2 %v528_v19  ;;  %1143 = vmatpush.msra.mxu3 %v528_v19 }
  0x28   : > { %547 = vmatpush.msrb.mxu0 %v528_v19  ;;  %1144 = vmatpush.msra.mxu1 %v527_v20 }
  0x29   : > { %1145 = vmatpush.msra.mxu2 %v527_v20  ;;  %1146 = vmatpush.msra.mxu3 %v527_v20 }
  0x2a   : > { %1186 = vset.pattern.permute.xlu1 %v1198_v13  ;;  %548 = vmatpush.msrb.mxu0 %v527_v20 }
  0x2b   : > { %290 = vperm.xlu1 %1186, %v201_v7   ;;  %1187 = vset.pattern.permute.xlu0 %v1198_v13 }
  0x2c   : > { %1147 = vmatpush.msra.mxu1 %v526_v21  ;;  %1148 = vmatpush.msra.mxu2 %v526_v21 }
  0x2d   : > { %1116 = vmatmul.msk.f32.gmra.mxu0 %vm211_vm1, %v204_v6  ;;  %1149 = vmatpush.msra.mxu3 %v526_v21 }
  0x2e   : > { %549 = vmatpush.msrb.mxu0 %v526_v21  ;;  %1150 = vmatpush.msra.mxu1 %v525_v22 }
  0x2f   : > { %1151 = vmatpush.msra.mxu2 %v525_v22  ;;  %1152 = vmatpush.msra.mxu3 %v525_v22 }
  0x30   : > { %550 = vmatpush.msrb.mxu0 %v525_v22  ;;  %1153 = vmatpush.msra.mxu1 %v524_v23 }
  0x31   : > { %1154 = vmatpush.msra.mxu2 %v524_v23  ;;  %1155 = vmatpush.msra.mxu3 %v524_v23 }
  0x32   : > { %551 = vmatpush.msrb.mxu0 %v524_v23  ;;  %1156 = vmatpush.msra.mxu1 %v523_v24 }
  0x33   : > { %1157 = vmatpush.msra.mxu2 %v523_v24  ;;  %1158 = vmatpush.msra.mxu3 %v523_v24 }
  0x34   : > { %552 = vmatpush.msrb.mxu0 %v523_v24  ;;  %1159 = vmatpush.msra.mxu1 %v522_v25 }
  0x35   : > { %1117 = vmatmul.msk.f32.gmra.mxu0 %vm211_vm1, %v205_v16  ;;  %1160 = vmatpush.msra.mxu2 %v522_v25 }
  0x36   : > { %553 = vmatpush.msrb.mxu0 %v522_v25  ;;  %1161 = vmatpush.msra.mxu3 %v522_v25 }
  0x37   : > { %1162 = vmatpush.msra.mxu1 %v521_v26  ;;  %1163 = vmatpush.msra.mxu2 %v521_v26 }
  0x38   : > { %554 = vmatpush.msrb.mxu0 %v521_v26  ;;  %1164 = vmatpush.msra.mxu3 %v521_v26 }
  0x39   : > { %1165 = vmatpush.msra.mxu1 %v520_v27  ;;  %1166 = vmatpush.msra.mxu2 %v520_v27 }
  0x3a   : > { %555 = vmatpush.msrb.mxu0 %v520_v27  ;;  %1167 = vmatpush.msra.mxu3 %v520_v27 }
  0x6b   : > { %v269_v28 = vpop.permute.xlu2 %268 }
  0x6c   : > { %v285_v34 = vmul.f32 %v1319_v31, %v269_v28 }
  0x76   : > { %v295_v33 = vpop.permute.xlu2 %294 }
  0x77   : > { %v311_v36 = vmul.f32 %v1322_v32, %v295_v33 }
  0x79   : > { %v1328_v39 = vadd.f32 %v311_v36, %v285_v34 }
  0x7b   : > { %v368_v42 = vperm.slane %v1328_v39, 0  ;;  %v332_v43 = vrot.slane %v1328_v39, 1  ;;  %v333_v54 = vrot.slane %v1328_v39, 2  ;;  %v334_v8 = vrot.slane %v1328_v39, 3 }
  0x7d   : > { %v369_v48 = vperm.slane %v332_v43, 0  ;;  %v370_v0 = vperm.slane %v333_v54, 0  ;;  %v371_v27 = vperm.slane %v334_v8, 0 }
  0x82   : > { %v277_v29 = vpop.permute.xlu1 %276 }
  0x83   : > { %v273_v30 = vpop.permute.xlu0 %272  ;;  %v287_v49 = vmul.f32 %v1319_v31, %v277_v29 }
  0x84   : > { %v286_v40 = vmul.f32 %v1319_v31, %v273_v30 }
  0x8b   : > { %v303_v35 = vpop.permute.xlu1 %302 }
  0x8c   : > { %v299_v38 = vpop.permute.xlu0 %298  ;;  %v313_v50 = vmul.f32 %v1322_v32, %v303_v35 }
  0x8d   : > { %v312_v41 = vmul.f32 %v1322_v32, %v299_v38 }
  0x8e   : > { %v1345_v55 = vadd.f32 %v313_v50, %v287_v49 }
  0x8f   : > { %v1334_v44 = vadd.f32 %v312_v41, %v286_v40 }
  0x90   : > { %v350_v4 = vrot.slane %v1345_v55, 5  ;;  %v351_v22 = vrot.slane %v1345_v55, 6 }
  0x91   : > { %v340_v52 = vrot.slane %v1334_v44, 2  ;;  %v341_v63 = vrot.slane %v1334_v44, 3  ;;  %v342_v16 = vrot.slane %v1334_v44, 4  ;;  %v339_v17 = vrot.slane %v1334_v44, 1 }
  0x92   : > { %v1326_v37 = vpop.f32.mrf.mxu0  ;;  %v389_v14 = vperm.slane %v350_v4, 0  ;;  %v390_v35 = vperm.slane %v351_v22, 0  ;;  %v343_v50 = vrot.slane %v1334_v44, 5  ;;  %v344_v8 = vrot.slane %v1334_v44, 6 }
  0x93   : > { %v378_v58 = vperm.slane %v340_v52, 0  ;;  %v379_v6 = vperm.slane %v341_v63, 0  ;;  %v1375_v28 = vperm.slane %v339_v17, 0  ;;  %v380_v30 = vperm.slane %v342_v16, 0 }
  0x94   : > { %v1336_v45 = vpop.permute.xlu1 %280  ;;  %v349_v52 = vrot.slane %v1345_v55, 4  ;;  %v381_v63 = vperm.slane %v343_v50, 0  ;;  %v382_v17 = vperm.slane %v344_v8, 0  ;;  %v337_v22 = vrot.slane %v1328_v39, 6 }
  0x95   : > { %v265_v53 = vpop.permute.xlu0 %264  ;;  %v338_v50 = vrot.slane %v1328_v39, 7 }
  0x96   : > { %v284_v56 = vmul.f32 %v1319_v31, %v265_v53 }
  0x9a   : > { %v1338_v46 = vpop.f32.mrf.mxu0 }
  0x9b   : > { %v448_v47 = vsub.f32 %v1338_v46, %v368_v42  ;;  %v449_v57 = vsub.f32 %v1338_v46, %v369_v48  ;;  %v450_v12 = vsub.f32 %v1338_v46, %v370_v0  ;;  %v451_v40 = vsub.f32 %v1338_v46, %v371_v27 }
  0x9c   : > { %v335_v42 = vrot.slane %v1328_v39, 4 }
  0x9d   : > { %v488_v51 = vmax.f32 %v448_v47, 0.0  ;;  %v291_v59 = vpop.permute.xlu1 %290  ;;  %v489_v2 = vmax.f32 %v449_v57, 0.0  ;;  %v490_v24 = vmax.f32 %v450_v12, 0.0  ;;  %v307_v47 = vpop.permute.xlu2 %306  ;;  %v491_v53 = vmax.f32 %v451_v40, 0.0 }
  0x9e   : > { %v310_v61 = vmul.f32 %v1322_v32, %v291_v59  ;;  %v288_v57 = vmul.f32 %v1319_v31, %v1336_v45 }
  0x9f   : > { %580 = vmatmul.f32.vlgmr.msra.gmra.mxu1 %v488_v51  ;;  %v352_v51 = vrot.slane %v1345_v55, 7 }
  0xa0   : > { %v1354_v1 = vadd.f32 %v310_v61, %v284_v56  ;;  %v372_v56 = vperm.slane %v335_v42, 0  ;;  %v1395_v61 = vperm.slane %v349_v52, 0 }
  0xa2   : > { %v1349_v60 = vpop.f32.mrf.mxu0  ;;  %v360_v5 = vperm.slane %v1354_v1, 0  ;;  %v325_v7 = vrot.slane %v1354_v1, 1  ;;  %v330_v9 = vrot.slane %v1354_v1, 6  ;;  %v331_v10 = vrot.slane %v1354_v1, 7 }
  0xa3   : > { %v458_v62 = vsub.f32 %v1349_v60, %v378_v58  ;;  %v459_v13 = vsub.f32 %v1349_v60, %v379_v6  ;;  %v326_v33 = vrot.slane %v1354_v1, 2  ;;  %v457_v38 = vsub.f32 %v1349_v60, %v1375_v28 }
  0xa4   : > { %v440_v11 = vsub.f32 %v1326_v37, %v360_v5  ;;  %v361_v20 = vperm.slane %v325_v7, 0  ;;  %v1370_v21 = vperm.slane %v330_v9, 0  ;;  %v1373_v23 = vperm.slane %v331_v10, 0 }
  0xa5   : > { %v498_v3 = vmax.f32 %v458_v62, 0.0  ;;  %v499_v25 = vmax.f32 %v459_v13, 0.0  ;;  %v460_v41 = vsub.f32 %v1349_v60, %v380_v30  ;;  %v362_v49 = vperm.slane %v326_v33, 0 }
  0xa6   : > { %v480_v18 = vmax.f32 %v440_v11, 0.0  ;;  %v441_v29 = vsub.f32 %v1326_v37, %v361_v20  ;;  %v446_v34 = vsub.f32 %v1326_v37, %v1370_v21  ;;  %v447_v36 = vsub.f32 %v1326_v37, %v1373_v23 }
  0xa7   : > { %583 = vmatmul.f32.gmra.mxu1 %v489_v2  ;;  %610 = vmatmul.f32.vlgmr.msra.gmra.mxu2 %v498_v3  ;;  %v500_v54 = vmax.f32 %v460_v41, 0.0  ;;  %v314_v58 = vmul.f32 %v1322_v32, %v307_v47  ;;  %v442_v62 = vsub.f32 %v1326_v37, %v362_v49  ;;  %v327_v0 = vrot.slane %v1354_v1, 3 }
  0xa8   : > { %556 = vmatmul.f32.vlgmr.msrb.gmra.mxu0 %v480_v18  ;;  %v481_v48 = vmax.f32 %v441_v29, 0.0  ;;  %v391_v2 = vperm.slane %v352_v51, 0  ;;  %v452_v4 = vsub.f32 %v1338_v46, %v372_v56  ;;  %v461_v31 = vsub.f32 %v1349_v60, %v381_v63 }
  0xa9   : > { %v336_v32 = vrot.slane %v1328_v39, 5  ;;  %v1404_v45 = vadd.f32 %v314_v58, %v288_v57  ;;  %v482_v6 = vmax.f32 %v442_v62, 0.0  ;;  %v363_v7 = vperm.slane %v327_v0, 0 }
  0xaa   : > { %v1365_v15 = vpop.f32.mrf.mxu0  ;;  %v492_v9 = vmax.f32 %v452_v4, 0.0  ;;  %v501_v10 = vmax.f32 %v461_v31, 0.0  ;;  %v328_v18 = vrot.slane %v1354_v1, 4  ;;  %v462_v20 = vsub.f32 %v1349_v60, %v382_v17 }
  0xab   : > { %v469_v19 = vsub.f32 %v1365_v15, %v389_v14  ;;  %v470_v43 = vsub.f32 %v1365_v15, %v390_v35  ;;  %v468_v3 = vsub.f32 %v1365_v15, %v1395_v61  ;;  %v471_v5 = vsub.f32 %v1365_v15, %v391_v2 }
  0xac   : > { %v373_v11 = vperm.slane %v336_v32, 0  ;;  %v392_v13 = vperm.slane %v1404_v45, 0  ;;  %v443_v16 = vsub.f32 %v1326_v37, %v363_v7  ;;  %v364_v27 = vperm.slane %v328_v18, 0 }
  0xad   : > { %v509_v26 = vmax.f32 %v469_v19, 0.0  ;;  %v510_v59 = vmax.f32 %v470_v43, 0.0  ;;  %v511_v12 = vmax.f32 %v471_v5, 0.0  ;;  %v345_v29 = vrot.slane %v1334_v44, 7 }
  0xae   : > { %v453_v19 = vsub.f32 %v1338_v46, %v373_v11  ;;  %v502_v33 = vmax.f32 %v462_v20, 0.0  ;;  %v374_v35 = vperm.slane %v337_v22, 0  ;;  %v444_v42 = vsub.f32 %v1326_v37, %v364_v27 }
  0xaf   : > { %586 = vmatmul.f32.gmra.mxu1 %v490_v24  ;;  %613 = vmatmul.f32.gmra.mxu2 %v499_v25  ;;  %v353_v25 = vrot.slane %v1404_v45, 1  ;;  %v383_v43 = vperm.slane %v345_v29, 0  ;;  %v329_v47 = vrot.slane %v1354_v1, 5  ;;  %v354_v52 = vrot.slane %v1404_v45, 2 }
  0xb0   : > { %643 = vmatmul.f32.vlgmr.msra.gmra.mxu3 %v509_v26  ;;  %559 = vmatmul.f32.gmra.mxu0 %v481_v48  ;;  %v483_v26 = vmax.f32 %v443_v16, 0.0  ;;  %v493_v30 = vmax.f32 %v453_v19, 0.0  ;;  %v454_v48 = vsub.f32 %v1338_v46, %v374_v35  ;;  %v375_v58 = vperm.slane %v338_v50, 0 }
  0xb1   : > { %v393_v41 = vperm.slane %v353_v25, 0  ;;  %v463_v49 = vsub.f32 %v1349_v60, %v383_v43  ;;  %v394_v62 = vperm.slane %v354_v52, 0  ;;  %v384_v63 = vperm.slane %v1345_v55, 0 }
  0xb2   : > { %v1409_v14 = vpop.f32.mrf.mxu0  ;;  %v494_v56 = vmax.f32 %v454_v48, 0.0  ;;  %v455_v39 = vsub.f32 %v1338_v46, %v375_v58  ;;  %v355_v4 = vrot.slane %v1404_v45, 3  ;;  %v346_v32 = vrot.slane %v1345_v55, 1 }
  0xb3   : > { %v472_v24 = vsub.f32 %v1409_v14, %v392_v13  ;;  %v473_v51 = vsub.f32 %v1409_v14, %v393_v41  ;;  %v503_v57 = vmax.f32 %v463_v49, 0.0  ;;  %v464_v0 = vsub.f32 %v1365_v15, %v384_v63 }
  0xb4   : > { %v474_v2 = vsub.f32 %v1409_v14, %v394_v62  ;;  %v495_v5 = vmax.f32 %v455_v39, 0.0  ;;  %v395_v8 = vperm.slane %v355_v4, 0  ;;  %v356_v13 = vrot.slane %v1404_v45, 4 }
  0xb5   : > { %v512_v40 = vmax.f32 %v472_v24, 0.0  ;;  %v486_v16 = vmax.f32 %v446_v34, 0.0  ;;  %v347_v17 = vrot.slane %v1345_v55, 2  ;;  %v487_v21 = vmax.f32 %v447_v36, 0.0 }
  0xb6   : > { %v514_v7 = vmax.f32 %v474_v2, 0.0  ;;  %v396_v20 = vperm.slane %v356_v13, 0  ;;  %v348_v34 = vrot.slane %v1345_v55, 3  ;;  %v497_v27 = vmax.f32 %v457_v38, 0.0 }
  0xb7   : > { %589 = vmatmul.f32.gmra.mxu1 %v491_v53  ;;  %616 = vmatmul.f32.gmra.mxu2 %v500_v54  ;;  %v484_v53 = vmax.f32 %v444_v42, 0.0  ;;  %v365_v54 = vperm.slane %v329_v47, 0  ;;  %v386_v22 = vperm.slane %v347_v17, 0  ;;  %v359_v28 = vrot.slane %v1404_v45, 7 }
  0xb8   : > { %646 = vmatmul.f32.gmra.mxu3 %v510_v59  ;;  %562 = vmatmul.f32.gmra.mxu0 %v482_v6  ;;  %v513_v59 = vmax.f32 %v473_v51, 0.0  ;;  %v504_v6 = vmax.f32 %v464_v0, 0.0  ;;  %v476_v25 = vsub.f32 %v1409_v14, %v396_v20  ;;  %v387_v35 = vperm.slane %v348_v34, 0  ;;  %v1464_v51 = vld [vmem:[%s1613_s3] ss:$0 sm:$0xff] }
  0xb9   : > { %v445_v1 = vsub.f32 %v1326_v37, %v365_v54  ;;  %v466_v24 = vsub.f32 %v1365_v15, %v386_v22  ;;  %v358_v37 = vrot.slane %v1404_v45, 6  ;;  %v508_v38 = vmax.f32 %v468_v3, 0.0 }
  0xba   : > { %v399_v43 = vperm.slane %v359_v28, 0 }
  0xbb   : > { %v485_v31 = vmax.f32 %v445_v1, 0.0  ;;  %v506_v29 = vmax.f32 %v466_v24, 0.0  ;;  %v398_v36 = vperm.slane %v358_v37, 0 }
  0xbc   : > { %v479_v47 = vsub.f32 %v1409_v14, %v399_v43 }
  0xbe   : > { %v519_v48 = vmax.f32 %v479_v47, 0.0 }
  0xbf   : > { %592 = vmatmul.f32.gmra.mxu1 %v492_v9  ;;  %619 = vmatmul.f32.gmra.mxu2 %v501_v10  ;;  %v376_v9 = vperm.slane %v1334_v44, 0  ;;  %v385_v10 = vperm.slane %v346_v32, 0 }
  0xc0   : > { %649 = vmatmul.f32.gmra.mxu3 %v511_v12  ;;  %565 = vmatmul.f32.gmra.mxu0 %v483_v26  ;;  %v475_v12 = vsub.f32 %v1409_v14, %v395_v8  ;;  %v357_v26 = vrot.slane %v1404_v45, 5 }
  0xc1   : > { %v456_v46 = vsub.f32 %v1349_v60, %v376_v9  ;;  %v465_v11 = vsub.f32 %v1365_v15, %v385_v10  ;;  %v478_v60 = vsub.f32 %v1409_v14, %v398_v36 }
  0xc2   : > { %v515_v44 = vmax.f32 %v475_v12, 0.0 }
  0xc3   : > { %v496_v18 = vmax.f32 %v456_v46, 0.0  ;;  %v505_v19 = vmax.f32 %v465_v11, 0.0  ;;  %v518_v42 = vmax.f32 %v478_v60, 0.0 }
  0xc7   : > { %595 = vmatmul.f32.gmra.mxu1 %v493_v30  ;;  %622 = vmatmul.f32.gmra.mxu2 %v502_v33  ;;  %v516_v30 = vmax.f32 %v476_v25, 0.0  ;;  %v397_v33 = vperm.slane %v357_v26, 0 }
  0xc8   : > { %652 = vmatmul.f32.gmra.mxu3 %v512_v40  ;;  %568 = vmatmul.f32.gmra.mxu0 %v484_v53  ;;  %v467_v40 = vsub.f32 %v1365_v15, %v387_v35 }
  0xc9   : > { %v477_v41 = vsub.f32 %v1409_v14, %v397_v33 }
  0xca   : > { %v507_v23 = vmax.f32 %v467_v40, 0.0 }
  0xcb   : > { %v517_v55 = vmax.f32 %v477_v41, 0.0 }
  0xcf   : > { %598 = vmatmul.f32.gmra.mxu1 %v494_v56  ;;  %625 = vmatmul.f32.gmra.mxu2 %v503_v57 }
  0xd0   : > { %655 = vmatmul.f32.gmra.mxu3 %v513_v59  ;;  %571 = vmatmul.f32.gmra.mxu0 %v485_v31 }
  0xd7   : > { %601 = vmatmul.f32.gmra.mxu1 %v495_v5  ;;  %628 = vmatmul.f32.gmra.mxu2 %v504_v6 }
  0xd8   : > { %658 = vmatmul.f32.gmra.mxu3 %v514_v7  ;;  %574 = vmatmul.f32.gmra.mxu0 %v486_v16 }
  0xdf   : > { %604 = vmatmul.f32.gmra.mxu1 %v496_v18  ;;  %631 = vmatmul.f32.gmra.mxu2 %v505_v19 }
  0xe0   : > { %661 = vmatmul.f32.gmra.mxu3 %v515_v44  ;;  %577 = vmatmul.f32.gmra.mxu0 %v487_v21 }
  0xe7   : > { %607 = vmatmul.f32.gmra.mxu1 %v497_v27  ;;  %634 = vmatmul.f32.gmra.mxu2 %v506_v29 }
  0xe8   : > { %664 = vmatmul.f32.gmra.mxu3 %v516_v30 }
  0xef   : > { %637 = vmatmul.f32.gmra.mxu2 %v507_v23 }
  0xf0   : > { %667 = vmatmul.f32.gmra.mxu3 %v517_v55 }
  0xf7   : > { %640 = vmatmul.f32.gmra.mxu2 %v508_v38 }
  0xf8   : > { %670 = vmatmul.f32.gmra.mxu3 %v518_v42 }
 0x100   : > { %673 = vmatmul.f32.gmra.mxu3 %v519_v48 }
 0x11c   : > { %v581_v49 = vpop.f32.mrf.mxu1 }
 0x11d   : > { %v582_v15 = vadd.f32 %v1464_v51, %v581_v49 }
 0x11f   : > { %v685_v53 = vmax.f32 %v582_v15, 0.0 }
 0x121   : > { %v765_v62 = vrot.slane %v685_v53, 4 }
 0x123   : > { %v766_v5 = vmax.f32 %v685_v53, %v765_v62 }
 0x124   : > { %v584_v50 = vpop.f32.mrf.mxu1 }
 0x125   : > { %v557_v45 = vpop.f32.mrf.mxu0  ;;  %v585_v61 = vadd.f32 %v1464_v51, %v584_v50  ;;  %v767_v17 = vrot.slane %v766_v5, 2 }
 0x126   : > { %v558_v56 = vadd.f32 %v1464_v51, %v557_v45 }
 0x127   : > { %v686_v54 = vmax.f32 %v585_v61, 0.0  ;;  %v768_v30 = vmax.f32 %v766_v5, %v767_v17 }
 0x128   : > { %v677_v2 = vmax.f32 %v558_v56, 0.0 }
 0x129   : > { %v771_v1 = vrot.slane %v686_v54, 4  ;;  %v769_v47 = vrot.slane %v768_v30, 1 }
 0x12a   : > { %v611_v52 = vpop.f32.mrf.mxu2  ;;  %v717_v9 = vrot.slane %v677_v2, 4 }
 0x12b   : > { %v612_v57 = vadd.f32 %v1464_v51, %v611_v52  ;;  %v772_v6 = vmax.f32 %v686_v54, %v771_v1  ;;  %v770_v62 = vmax.f32 %v768_v30, %v769_v47 }
 0x12c   : > { %v587_v3 = vpop.f32.mrf.mxu1  ;;  %v718_v25 = vmax.f32 %v677_v2, %v717_v9 }
 0x12d   : > { %v588_v14 = vadd.f32 %v1464_v51, %v587_v3  ;;  %v560_v58 = vpop.f32.mrf.mxu0  ;;  %v695_v4 = vmax.f32 %v612_v57, 0.0  ;;  %v773_v18 = vrot.slane %v772_v6, 2 }
 0x12e   : > { %v561_v31 = vadd.f32 %v1464_v51, %v560_v58  ;;  %v719_v37 = vrot.slane %v718_v25, 2 }
 0x12f   : > { %v687_v63 = vmax.f32 %v588_v14, 0.0  ;;  %v825_v46 = vrot.slane %v695_v4, 4  ;;  %v774_v33 = vmax.f32 %v772_v6, %v773_v18 }
 0x130   : > { %v678_v11 = vmax.f32 %v561_v31, 0.0  ;;  %v720_v3 = vmax.f32 %v718_v25, %v719_v37 }
 0x131   : > { %v777_v7 = vrot.slane %v687_v63, 4  ;;  %v826_v34 = vmax.f32 %v695_v4, %v825_v46  ;;  %v775_v48 = vrot.slane %v774_v33, 1 }
 0x132   : > { %v614_v59 = vpop.f32.mrf.mxu2  ;;  %v723_v27 = vrot.slane %v678_v11, 4 }
 0x133   : > { %v644_v39 = vpop.f32.mrf.mxu3  ;;  %v615_v32 = vadd.f32 %v1464_v51, %v614_v59  ;;  %v778_v19 = vmax.f32 %v687_v63, %v777_v7  ;;  %v827_v60 = vrot.slane %v826_v34, 2  ;;  %v776_v1 = vmax.f32 %v774_v33, %v775_v48 }
 0x134   : > { %v590_v0 = vpop.f32.mrf.mxu1  ;;  %v645_v8 = vadd.f32 %v1464_v51, %v644_v39  ;;  %v724_v28 = vmax.f32 %v678_v11, %v723_v27 }
 0x135   : > { %v591_v10 = vadd.f32 %v1464_v51, %v590_v0  ;;  %v696_v12 = vmax.f32 %v615_v32, 0.0  ;;  %v563_v13 = vpop.f32.mrf.mxu0  ;;  %v779_v35 = vrot.slane %v778_v19, 2  ;;  %v828_v56 = vmax.f32 %v826_v34, %v827_v60 }
 0x136   : > { %v706_v20 = vmax.f32 %v645_v8, 0.0  ;;  %v564_v22 = vadd.f32 %v1464_v51, %v563_v13  ;;  %v725_v57 = vrot.slane %v724_v28, 2  ;;  %v721_v32 = vrot.slane %v720_v3, 1 }
 0x137   : > { %v688_v26 = vmax.f32 %v591_v10, 0.0  ;;  %v831_v29 = vrot.slane %v696_v12, 4  ;;  %v780_v49 = vmax.f32 %v778_v19, %v779_v35  ;;  %v829_v8 = vrot.slane %v828_v56, 1 }
 0x138   : > { %v891_v40 = vrot.slane %v706_v20, 4  ;;  %v679_v41 = vmax.f32 %v564_v22, 0.0  ;;  %v726_v9 = vmax.f32 %v724_v28, %v725_v57  ;;  %v1011_v13 = vsel %vm997_vm2, %v776_v1, %v770_v62 }
 0x139   : > { %v783_v23 = vrot.slane %v688_v26, 4  ;;  %v832_v38 = vmax.f32 %v696_v12, %v831_v29  ;;  %v781_v63 = vrot.slane %v780_v49, 1  ;;  %v1486_v29 = vmax.f32 %v828_v56, %v829_v8 }
 0x13a   : > { %v617_v16 = vpop.f32.mrf.mxu2  ;;  %v892_v52 = vmax.f32 %v706_v20, %v891_v40  ;;  %v729_v15 = vrot.slane %v679_v41, 4  ;;  %v727_v30 = vrot.slane %v726_v9, 1 }
 0x13b   : > { %v647_v44 = vpop.f32.mrf.mxu3  ;;  %v618_v21 = vadd.f32 %v1464_v51, %v617_v16  ;;  %v784_v53 = vmax.f32 %v688_v26, %v783_v23  ;;  %v833_v58 = vrot.slane %v832_v38, 2  ;;  %v782_v16 = vmax.f32 %v780_v49, %v781_v63 }
 0x13c   : > { %v593_v24 = vpop.f32.mrf.mxu1  ;;  %v648_v50 = vadd.f32 %v1464_v51, %v647_v44  ;;  %v893_v0 = vrot.slane %v892_v52, 2  ;;  %v730_v2 = vmax.f32 %v679_v41, %v729_v15  ;;  %v722_v26 = vmax.f32 %v720_v3, %v721_v32 }
 0x13d   : > { %v697_v55 = vmax.f32 %v618_v21, 0.0  ;;  %v594_v36 = vadd.f32 %v1464_v51, %v593_v24  ;;  %v566_v42 = vpop.f32.mrf.mxu0  ;;  %v785_v5 = vrot.slane %v784_v53, 2  ;;  %v834_v10 = vmax.f32 %v832_v38, %v833_v58 }
 0x13e   : > { %v567_v59 = vadd.f32 %v1464_v51, %v566_v42  ;;  %v707_v39 = vmax.f32 %v648_v50, 0.0  ;;  %v894_v44 = vmax.f32 %v892_v52, %v893_v0  ;;  %v731_v20 = vrot.slane %v730_v2, 2 }
 0x13f   : > { %v837_v54 = vrot.slane %v697_v55, 4  ;;  %v689_v14 = vmax.f32 %v594_v36, 0.0  ;;  %v786_v21 = vmax.f32 %v784_v53, %v785_v5  ;;  %v835_v33 = vrot.slane %v834_v10, 1 }
 0x140   : > { %v680_v46 = vmax.f32 %v567_v59, 0.0  ;;  %v897_v17 = vrot.slane %v707_v39, 4  ;;  %v1012_v40 = vsel %vm999_vm3, %v782_v16, %v1011_v13  ;;  %v732_v36 = vmax.f32 %v730_v2, %v731_v20 }
 0x141   : > { %v838_v6 = vmax.f32 %v697_v55, %v837_v54  ;;  %v789_v7 = vrot.slane %v689_v14, 4  ;;  %v895_v55 = vrot.slane %v894_v44, 1  ;;  %v787_v38 = vrot.slane %v786_v21, 1 }
 0x142   : > { %v620_v43 = vpop.f32.mrf.mxu2  ;;  %v735_v35 = vrot.slane %v680_v46, 4  ;;  %v898_v41 = vmax.f32 %v707_v39, %v897_v17  ;;  %v728_v48 = vmax.f32 %v726_v9, %v727_v30  ;;  %v1491_v49 = vmax.f32 %v834_v10, %v835_v33 }
 0x143   : > { %v650_v45 = vpop.f32.mrf.mxu3  ;;  %v621_v4 = vadd.f32 %v1464_v51, %v620_v43  ;;  %v839_v34 = vrot.slane %v838_v6, 2  ;;  %v790_v27 = vmax.f32 %v689_v14, %v789_v7  ;;  %v1494_v56 = vmax.f32 %v894_v44, %v895_v55 }
 0x144   : > { %v596_v61 = vpop.f32.mrf.mxu1  ;;  %v651_v37 = vadd.f32 %v1464_v51, %v650_v45  ;;  %v736_v50 = vmax.f32 %v680_v46, %v735_v35  ;;  %v899_v3 = vrot.slane %v898_v41, 2  ;;  %v733_v57 = vrot.slane %v732_v36, 1 }
 0x145   : > { %v597_v31 = vadd.f32 %v1464_v51, %v596_v61  ;;  %v569_v11 = vpop.f32.mrf.mxu0  ;;  %v698_v22 = vmax.f32 %v621_v4, 0.0  ;;  %v840_v42 = vmax.f32 %v838_v6, %v839_v34  ;;  %v791_v43 = vrot.slane %v790_v27, 2 }
 0x146   : > { %v570_v24 = vadd.f32 %v1464_v51, %v569_v11  ;;  %v708_v45 = vmax.f32 %v651_v37, 0.0  ;;  %v788_v62 = vmax.f32 %v786_v21, %v787_v38  ;;  %v998_v2 = vsel %vm997_vm2, %v728_v48, %v722_v26 }
 0x147   : > { %v690_v18 = vmax.f32 %v597_v31, 0.0  ;;  %v843_v60 = vrot.slane %v698_v22, 4  ;;  %v841_v1 = vrot.slane %v840_v42, 1  ;;  %v792_v63 = vmax.f32 %v790_v27, %v791_v43 }
 0x148   : > { %v681_v28 = vmax.f32 %v570_v24, 0.0  ;;  %v737_v4 = vrot.slane %v736_v50, 2  ;;  %v1498_v5 = vmax.f32 %v898_v41, %v899_v3  ;;  %v903_v6 = vrot.slane %v708_v45, 4 }
 0x149   : > { %v795_v23 = vrot.slane %v690_v18, 4  ;;  %v844_v58 = vmax.f32 %v698_v22, %v843_v60  ;;  %v734_v9 = vmax.f32 %v732_v36, %v733_v57  ;;  %v1501_v13 = vmax.f32 %v840_v42, %v841_v1 }
 0x14a   : > { %v623_v12 = vpop.f32.mrf.mxu2  ;;  %v741_v59 = vrot.slane %v681_v28, 4  ;;  %v793_v16 = vrot.slane %v792_v63, 1  ;;  %v901_v26 = vrot.slane %v1498_v5, 1  ;;  %v1511_v21 = vmax.f32 %v708_v45, %v903_v6 }
 0x14b   : > { %v1483_v19 = vpop.f32.mrf.mxu3  ;;  %v624_v52 = vadd.f32 %v1464_v51, %v623_v12  ;;  %v796_v53 = vmax.f32 %v690_v18, %v795_v23  ;;  %v845_v10 = vrot.slane %v844_v58, 2  ;;  %v1013_v12 = vsel %vm1001_vm4, %v788_v62, %v1012_v40 }
 0x14c   : > { %v599_v25 = vpop.f32.mrf.mxu1  ;;  %v742_v46 = vmax.f32 %v681_v28, %v741_v59  ;;  %v738_v18 = vmax.f32 %v736_v50, %v737_v4  ;;  %v1505_v20 = vadd.f32 %v1464_v51, %v1483_v19  ;;  %v1516_v33 = vsel %vm999_vm3, %v734_v9, %v998_v2 }
 0x14d   : > { %v600_v47 = vadd.f32 %v1464_v51, %v599_v25  ;;  %v572_v15 = vpop.f32.mrf.mxu0  ;;  %v699_v31 = vmax.f32 %v624_v52, 0.0  ;;  %v797_v7 = vrot.slane %v796_v53, 2  ;;  %v846_v35 = vmax.f32 %v844_v58, %v845_v10 }
 0x14e   : > { %v573_v32 = vadd.f32 %v1464_v51, %v572_v15  ;;  %v743_v19 = vrot.slane %v742_v46, 2  ;;  %v794_v41 = vmax.f32 %v792_v63, %v793_v16  ;;  %v739_v36 = vrot.slane %v738_v18, 1 }
 0x14f   : > { %v691_v54 = vmax.f32 %v600_v47, 0.0  ;;  %v849_v44 = vrot.slane %v699_v31, 4  ;;  %v798_v34 = vmax.f32 %v796_v53, %v797_v7  ;;  %v709_v28 = vmax.f32 %v1505_v20, 0.0 }
 0x150   : > { %v682_v11 = vmax.f32 %v573_v32, 0.0  ;;  %v905_v42 = vrot.slane %v1511_v21, 2  ;;  %v847_v52 = vrot.slane %v846_v35, 1  ;;  %v744_v15 = vmax.f32 %v742_v46, %v743_v19 }
 0x151   : > { %v801_v39 = vrot.slane %v691_v54, 4  ;;  %v850_v60 = vmax.f32 %v699_v31, %v849_v44  ;;  %v799_v43 = vrot.slane %v798_v34, 1  ;;  %v740_v58 = vmax.f32 %v738_v18, %v739_v36 }
 0x152   : > { %v626_v61 = vpop.f32.mrf.mxu2  ;;  %v747_v27 = vrot.slane %v682_v11, 4  ;;  %v909_v62 = vrot.slane %v709_v28, 4  ;;  %v1525_v6 = vmax.f32 %v846_v35, %v847_v52 }
 0x153   : > { %v656_v14 = vpop.f32.mrf.mxu3  ;;  %v802_v8 = vmax.f32 %v691_v54, %v801_v39  ;;  %v627_v23 = vadd.f32 %v1464_v51, %v626_v61  ;;  %v1014_v61 = vsel %vm1003_vm5, %v794_v41, %v1013_v12  ;;  %v851_v59 = vrot.slane %v850_v60, 2 }
 0x154   : > { %v602_v0 = vpop.f32.mrf.mxu1  ;;  %v748_v47 = vmax.f32 %v682_v11, %v747_v27  ;;  %v657_v3 = vadd.f32 %v1464_v51, %v656_v14  ;;  %v800_v39 = vmax.f32 %v798_v34, %v799_v43  ;;  %v745_v14 = vrot.slane %v744_v15, 1 }
 0x155   : > { %v803_v17 = vrot.slane %v802_v8, 2  ;;  %v603_v22 = vadd.f32 %v1464_v51, %v602_v0  ;;  %v575_v24 = vpop.f32.mrf.mxu0  ;;  %v700_v54 = vmax.f32 %v627_v23, 0.0  ;;  %v1527_v12 = vmax.f32 %v850_v60, %v851_v59 }
 0x156   : > { %v576_v55 = vadd.f32 %v1464_v51, %v575_v24  ;;  %v749_v0 = vrot.slane %v748_v47, 2  ;;  %v710_v7 = vmax.f32 %v657_v3, 0.0  ;;  %v1015_v18 = vsel %vm1005_vm6, %v800_v39, %v1014_v61 }
 0x157   : > { %v692_v40 = vmax.f32 %v603_v22, 0.0  ;;  %v804_v37 = vmax.f32 %v802_v8, %v803_v17  ;;  %v855_v10 = vrot.slane %v700_v54, 4  ;;  %v746_v35 = vmax.f32 %v744_v15, %v745_v14 }
 0x158   : > { %v683_v48 = vmax.f32 %v576_v55, 0.0  ;;  %v750_v44 = vmax.f32 %v748_v47, %v749_v0  ;;  %v915_v41 = vrot.slane %v710_v7, 4  ;;  %v1002_v43 = vsel %vm1001_vm4, %v740_v58, %v1516_v33 }
 0x159   : > { %v807_v38 = vrot.slane %v692_v40, 4  ;;  %v805_v53 = vrot.slane %v804_v37, 1  ;;  %v853_v47 = vrot.slane %v1527_v12, 1 }
 0x15a   : > { %v1508_v25 = vpop.f32.mrf.mxu2  ;;  %v753_v57 = vrot.slane %v683_v48, 4 }
 0x15b   : > { %v1513_v30 = vpop.f32.mrf.mxu3  ;;  %v808_v45 = vmax.f32 %v692_v40, %v807_v38  ;;  %v806_v9 = vmax.f32 %v804_v37, %v805_v53  ;;  %v856_v40 = vmax.f32 %v700_v54, %v855_v10  ;;  %v630_v55 = vadd.f32 %v1464_v51, %v1508_v25 }
 0x15c   : > { %v605_v50 = vpop.f32.mrf.mxu1  ;;  %v754_v2 = vmax.f32 %v683_v48, %v753_v57  ;;  %v1546_v48 = vmax.f32 %v709_v28, %v909_v62  ;;  %v1004_v25 = vsel %vm1003_vm5, %v746_v35, %v1002_v43  ;;  %v916_v54 = vmax.f32 %v710_v7, %v915_v41 }
 0x15d   : > { %v809_v1 = vrot.slane %v808_v45, 2  ;;  %v606_v4 = vadd.f32 %v1464_v51, %v605_v50  ;;  %v578_v31 = vpop.f32.mrf.mxu0  ;;  %v1016_v19 = vsel %vm1007_vm7, %v806_v9, %v1015_v18  ;;  %v751_v50 = vrot.slane %v750_v44, 1 }
 0x15e   : > { %v755_v46 = vrot.slane %v754_v2, 2  ;;  %v579_v17 = vadd.f32 %v1464_v51, %v578_v31  ;;  %v857_v53 = vrot.slane %v856_v40, 2  ;;  %v701_v59 = vmax.f32 %v630_v55, 0.0 }
 0x15f   : > { %v810_v8 = vmax.f32 %v808_v45, %v809_v1  ;;  %v693_v11 = vmax.f32 %v606_v4, 0.0  ;;  %v752_v28 = vmax.f32 %v750_v44, %v751_v50  ;;  %v660_v62 = vadd.f32 %v1464_v51, %v1513_v30 }
 0x160   : > { %v756_v24 = vmax.f32 %v754_v2, %v755_v46  ;;  %v684_v34 = vmax.f32 %v579_v17, 0.0  ;;  %v858_v14 = vmax.f32 %v856_v40, %v857_v53  ;;  %v861_v10 = vrot.slane %v701_v59, 4 }
 0x161   : > { %v811_v16 = vrot.slane %v810_v8, 1  ;;  %v813_v20 = vrot.slane %v693_v11, 4  ;;  %v1006_v18 = vsel %vm1005_vm6, %v752_v28, %v1004_v25  ;;  %v711_v30 = vmax.f32 %v660_v62, 0.0 }
 0x162   : > { %v632_v63 = vpop.f32.mrf.mxu2  ;;  %v759_v60 = vrot.slane %v684_v34, 4  ;;  %v757_v15 = vrot.slane %v756_v24, 1 }
 0x163   : > { %v662_v32 = vpop.f32.mrf.mxu3  ;;  %v812_v22 = vmax.f32 %v810_v8, %v811_v16  ;;  %v633_v27 = vadd.f32 %v1464_v51, %v632_v63  ;;  %v814_v36 = vmax.f32 %v693_v11, %v813_v20  ;;  %v917_v8 = vrot.slane %v916_v54, 2 }
 0x164   : > { %v608_v37 = vpop.f32.mrf.mxu1  ;;  %v760_v3 = vmax.f32 %v684_v34, %v759_v60  ;;  %v663_v63 = vadd.f32 %v1464_v51, %v662_v32  ;;  %v758_v0 = vmax.f32 %v756_v24, %v757_v15  ;;  %v862_v60 = vmax.f32 %v701_v59, %v861_v10 }
 0x165   : > { %v1017_v23 = vsel %vm1009_vm8, %v812_v22, %v1016_v19  ;;  %v702_v45 = vmax.f32 %v633_v27, 0.0  ;;  %v609_v61 = vadd.f32 %v1464_v51, %v608_v37  ;;  %v815_v33 = vrot.slane %v814_v36, 2 }
 0x166   : > { %1045 = vst [vmem:[%s1536_s20 + $0x8] sm:$0xff] %v1017_v23  ;;  %v761_v58 = vrot.slane %v760_v3, 2  ;;  %v712_v44 = vmax.f32 %v663_v63, 0.0  ;;  %v1008_v22 = vsel %vm1007_vm7, %v758_v0, %v1006_v18  ;;  %v859_v37 = vrot.slane %v858_v14, 1 }
 0x167   : > { %v694_v1 = vmax.f32 %v609_v61, 0.0  ;;  %v867_v4 = vrot.slane %v702_v45, 4  ;;  %v816_v46 = vmax.f32 %v814_v36, %v815_v33  ;;  %v911_v15 = vrot.slane %v1546_v48, 2 }
 0x168   : > { %v762_v2 = vmax.f32 %v760_v3, %v761_v58  ;;  %v927_v3 = vrot.slane %v712_v44, 4  ;;  %v1564_v33 = vmax.f32 %v916_v54, %v917_v8  ;;  %v860_v62 = vmax.f32 %v858_v14, %v859_v37 }
 0x169   : > { %v819_v31 = vrot.slane %v694_v1, 4  ;;  %v868_v34 = vmax.f32 %v702_v45, %v867_v4  ;;  %v817_v23 = vrot.slane %v816_v46, 1  ;;  %v863_v63 = vrot.slane %v862_v60, 2 }
 0x16a   : > { %v635_v38 = vpop.f32.mrf.mxu2  ;;  %v763_v11 = vrot.slane %v762_v2, 1 }
 0x16b   : > { %v665_v52 = vpop.f32.mrf.mxu3  ;;  %v636_v57 = vadd.f32 %v1464_v51, %v635_v38  ;;  %v820_v16 = vmax.f32 %v694_v1, %v819_v31  ;;  %v921_v38 = vrot.slane %v711_v30, 4  ;;  %v869_v61 = vrot.slane %v868_v34, 2 }
 0x16c   : > { %v666_v9 = vadd.f32 %v1464_v51, %v665_v52  ;;  %v764_v24 = vmax.f32 %v762_v2, %v763_v11  ;;  %v854_v52 = vmax.f32 %v1527_v12, %v853_v47  ;;  %v818_v58 = vmax.f32 %v816_v46, %v817_v23 }
 0x16d   : > { %v703_v39 = vmax.f32 %v636_v57, 0.0  ;;  %v821_v27 = vrot.slane %v820_v16, 2  ;;  %v928_v12 = vmax.f32 %v712_v44, %v927_v3 }
 0x16e   : > { %v713_v19 = vmax.f32 %v666_v9, 0.0  ;;  %v1010_v55 = vsel %vm1009_vm8, %v764_v24, %v1008_v22 }
 0x16f   : > { %v873_v7 = vrot.slane %v703_v39, 4  ;;  %v822_v36 = vmax.f32 %v820_v16, %v821_v27  ;;  %1044 = vst [vmem:[%s1536_s20] sm:$0xff] %v1010_v55  ;;  %v864_v16 = vmax.f32 %v862_v60, %v863_v63  ;;  %v929_v44 = vrot.slane %v928_v12, 2 }
 0x170   : > { %v933_v53 = vrot.slane %v713_v19, 4 }
 0x171   : > { %v874_v35 = vmax.f32 %v703_v39, %v873_v7  ;;  %v823_v45 = vrot.slane %v822_v36, 1  ;;  %v922_v39 = vmax.f32 %v711_v30, %v921_v38  ;;  %v870_v7 = vmax.f32 %v868_v34, %v869_v61 }
 0x172   : > { %v638_v17 = vpop.f32.mrf.mxu2  ;;  %v934_v9 = vmax.f32 %v713_v19, %v933_v53 }
 0x173   : > { %v639_v32 = vadd.f32 %v1464_v51, %v638_v17  ;;  %v668_v20 = vpop.f32.mrf.mxu3  ;;  %v875_v25 = vrot.slane %v874_v35, 2  ;;  %v824_v1 = vmax.f32 %v822_v36, %v823_v45  ;;  %v923_v17 = vrot.slane %v922_v39, 2 }
 0x174   : > { %v669_v41 = vadd.f32 %v1464_v51, %v668_v20  ;;  %v871_v22 = vrot.slane %v870_v7, 1  ;;  %v935_v34 = vrot.slane %v934_v9, 2 }
 0x175   : > { %v704_v40 = vmax.f32 %v639_v32, 0.0  ;;  %v1018_v47 = vsel %vm997_vm2, %v824_v1, %v818_v58  ;;  %v876_v8 = vmax.f32 %v874_v35, %v875_v25  ;;  %v924_v37 = vmax.f32 %v922_v39, %v923_v17 }
 0x176   : > { %v714_v50 = vmax.f32 %v669_v41, 0.0  ;;  %v1019_v54 = vsel %vm999_vm3, %v1486_v29, %v1018_v47  ;;  %v865_v41 = vrot.slane %v864_v16, 1  ;;  %v936_v3 = vmax.f32 %v934_v9, %v935_v34 }
 0x177   : > { %v879_v43 = vrot.slane %v704_v40, 4  ;;  %v1020_v14 = vsel %vm1001_vm4, %v1491_v49, %v1019_v54  ;;  %v877_v49 = vrot.slane %v876_v8, 1  ;;  %v925_v53 = vrot.slane %v924_v37, 1 }
 0x178   : > { %v939_v28 = vrot.slane %v714_v50, 4  ;;  %v1021_v18 = vsel %vm1003_vm5, %v1501_v13, %v1020_v14  ;;  %v912_v13 = vmax.f32 %v1546_v48, %v911_v15  ;;  %v866_v25 = vmax.f32 %v864_v16, %v865_v41 }
 0x179   : > { %v880_v57 = vmax.f32 %v704_v40, %v879_v43  ;;  %v1022_v32 = vsel %vm1005_vm6, %v1525_v6, %v1021_v18  ;;  %v930_v6 = vmax.f32 %v928_v12, %v929_v44  ;;  %v906_v43 = vmax.f32 %v1511_v21, %v905_v42 }
 0x17a   : > { %v641_v59 = vpop.f32.mrf.mxu2  ;;  %v940_v10 = vmax.f32 %v714_v50, %v939_v28  ;;  %v1023_v24 = vsel %vm1007_vm7, %v854_v52, %v1022_v32  ;;  %v919_v50 = vrot.slane %v1564_v33, 1  ;;  %v872_v52 = vmax.f32 %v870_v7, %v871_v22 }
 0x17b   : > { %v881_v0 = vrot.slane %v880_v57, 2  ;;  %v671_v2 = vpop.f32.mrf.mxu3  ;;  %v642_v4 = vadd.f32 %v1464_v51, %v641_v59  ;;  %v1024_v27 = vsel %vm1009_vm8, %v860_v62, %v1023_v24  ;;  %v878_v45 = vmax.f32 %v876_v8, %v877_v49 }
 0x17c   : > { %v672_v31 = vadd.f32 %v1464_v51, %v671_v2  ;;  %v941_v35 = vrot.slane %v940_v10, 2  ;;  %1046 = vst [vmem:[%s1536_s20 + $0x10] sm:$0xff] %v1024_v27  ;;  %v913_v1 = vrot.slane %v912_v13, 1  ;;  %v931_v28 = vrot.slane %v930_v6, 1 }
 0x17d   : > { %v705_v46 = vmax.f32 %v642_v4, 0.0  ;;  %v882_v30 = vmax.f32 %v880_v57, %v881_v0  ;;  %v907_v62 = vrot.slane %v906_v43, 1  ;;  %v920_v63 = vmax.f32 %v1564_v33, %v919_v50 }
 0x17e   : > { %v715_v11 = vmax.f32 %v672_v31, 0.0  ;;  %v942_v48 = vmax.f32 %v940_v10, %v941_v35  ;;  %v1025_v21 = vsel %vm997_vm2, %v872_v52, %v866_v25  ;;  %v937_v42 = vrot.slane %v936_v3, 1 }
 0x17f   : > { %v885_v29 = vrot.slane %v705_v46, 4  ;;  %v883_v23 = vrot.slane %v882_v30, 1  ;;  %v1026_v39 = vsel %vm999_vm3, %v878_v45, %v1025_v21  ;;  %v902_v47 = vmax.f32 %v1498_v5, %v901_v26 }
 0x180   : > { %v945_v20 = vrot.slane %v715_v11, 4  ;;  %v943_v0 = vrot.slane %v942_v48, 1  ;;  %v926_v4 = vmax.f32 %v924_v37, %v925_v53  ;;  %v914_v54 = vmax.f32 %v912_v13, %v913_v1 }
 0x181   : > { %v886_v19 = vmax.f32 %v705_v46, %v885_v29  ;;  %v884_v57 = vmax.f32 %v882_v30, %v883_v23  ;;  %v932_v8 = vmax.f32 %v930_v6, %v931_v28  ;;  %v908_v14 = vmax.f32 %v906_v43, %v907_v62 }
 0x182   : > { %v946_v40 = vmax.f32 %v715_v11, %v945_v20  ;;  %v938_v10 = vmax.f32 %v936_v3, %v937_v42  ;;  %v1032_v11 = vsel %vm997_vm2, %v920_v63, %v914_v54  ;;  %v944_v16 = vmax.f32 %v942_v48, %v943_v0 }
 0x183   : > { %v674_v55 = vpop.f32.mrf.mxu3  ;;  %v887_v36 = vrot.slane %v886_v19, 2  ;;  %v1027_v31 = vsel %vm1001_vm4, %v884_v57, %v1026_v39  ;;  %v1033_v17 = vsel %vm999_vm3, %v926_v4, %v1032_v11 }
 0x184   : > { %v947_v60 = vrot.slane %v946_v40, 2  ;;  %v675_v38 = vadd.f32 %v1464_v51, %v674_v55  ;;  %v1034_v44 = vsel %vm1001_vm4, %v932_v8, %v1033_v17 }
 0x185   : > { %v888_v15 = vmax.f32 %v886_v19, %v887_v36  ;;  %v1035_v29 = vsel %vm1003_vm5, %v938_v10, %v1034_v44 }
 0x186   : > { %v716_v61 = vmax.f32 %v675_v38, 0.0  ;;  %v948_v58 = vmax.f32 %v946_v40, %v947_v60 }
 0x187   : > { %v889_v59 = vrot.slane %v888_v15, 1 }
 0x188   : > { %v951_v51 = vrot.slane %v716_v61, 4  ;;  %v949_v7 = vrot.slane %v948_v58, 1 }
 0x189   : > { %v890_v2 = vmax.f32 %v888_v15, %v889_v59 }
 0x18a   : > { %v952_v12 = vmax.f32 %v716_v61, %v951_v51  ;;  %v950_v30 = vmax.f32 %v948_v58, %v949_v7 }
 0x18b   : > { %v1028_v33 = vsel %vm1003_vm5, %v890_v2, %v1027_v31 }
 0x18c   : > { %v953_v9 = vrot.slane %v952_v12, 2  ;;  %v1029_v46 = vsel %vm1005_vm6, %v1494_v56, %v1028_v33  ;;  %v1036_v56 = vsel %vm1005_vm6, %v944_v16, %v1035_v29 }
 0x18d   : > { %v1030_v5 = vsel %vm1007_vm7, %v902_v47, %v1029_v46  ;;  %v1037_v22 = vsel %vm1007_vm7, %v950_v30, %v1036_v56 }
 0x18e   : > { %v954_v26 = vmax.f32 %v952_v12, %v953_v9  ;;  %v1031_v18 = vsel %vm1009_vm8, %v908_v14, %v1030_v5 }
 0x18f   : > { %1047 = vst [vmem:[%s1536_s20 + $0x18] sm:$0xff] %v1031_v18 }
 0x190   : > { %v955_v32 = vrot.slane %v954_v26, 1 }
 0x192   : > { %v956_v20 = vmax.f32 %v954_v26, %v955_v32 }
 0x194   : > { %v1038_v24 = vsel %vm1009_vm8, %v956_v20, %v1037_v22 }
 0x195   : > { %1048 = vst [vmem:[%s1536_s20 + $0x20] sm:$0xff] %v1038_v24 }
 0x196 PF: > { %s14_s15 = sadd.s32 1, %s1195_s15  }
 0x197   : > { %p11_p4 = scmp.ge.s32.totalorder %s14_s15, 4  }
 0x199   :  { %13 = sbr.rel (!%p11_p4) target bundleno = 1 (0x1), region = 66 }

</bundles_post_ra>
